<compile_context>
chip_gen: v7x
topology: tpu7x:2x2x1
jax: 0.10.0
libtpu: 0.0.40
codegen_flags: <defaults>
</compile_context>

<pallas_src>
import functools

import jax
import jax.numpy as jnp
from jax.experimental import pallas as pl
from jax.experimental.pallas import tpu as pltpu


_ONEHOT_MAX_VOCAB = 4096     # one-hot/MXU path for padded vocab up to this size
_VOCAB_CHUNK_TARGET = 512    # one-hot blocked along V in chunks of ~this size


def _round_up(x, m):
    return ((x + m - 1) // m) * m


# ---------------------------------------------------------------------------
# Kernels
# ---------------------------------------------------------------------------
def _embed_onehot_kernel(idx_ref, emb_ref, out_ref, *, v_chunk, num_chunks):
    """One tile of embedding rows via vocab-chunked one-hot matmul on the MXU.

    idx_ref : VMEM (T, 1) int32    -- token indices for this tile
    emb_ref : VMEM (Vp, Dp) float  -- full (padded) table, grid-invariant
    out_ref : VMEM (T, Dp) float   -- output tile
    """
    idx = idx_ref[...]                                        # (T, 1)
    t = idx.shape[0]

    acc = None
    for c in range(num_chunks):                               # static, <= 8 iters
        tbl_c = emb_ref[pl.ds(c * v_chunk, v_chunk), :]       # (Vc, Dp), table dtype
        iota = jax.lax.broadcasted_iota(jnp.int32, (t, v_chunk), 1) + c * v_chunk
        # One-hot built directly in the table dtype (no per-step fp32 cast of
        # the table); fp32 accumulation happens inside the MXU.
        onehot = (iota == idx).astype(tbl_c.dtype)            # (T, Vc)
        part = jnp.dot(onehot, tbl_c, preferred_element_type=jnp.float32)
        acc = part if acc is None else acc + part
    out_ref[...] = acc.astype(out_ref.dtype)


def _embed_row_gather_kernel(idx_smem_ref, emb_ref, out_ref, *, tile):
    """One tile of embedding rows via scalar-addressed VMEM row reads.

    idx_smem_ref : SMEM (Npad,) int32 -- all token indices (scalar-prefetched)
    emb_ref      : VMEM (Vp, Dp)      -- full table, grid-invariant
    out_ref      : VMEM (T, Dp)       -- output tile
    """
    base = pl.program_id(0) * tile

    def body(t, carry):
        row = idx_smem_ref[base + t]        # SMEM scalar read -> sreg address
        out_ref[t, :] = emb_ref[row, :]     # addressed VMEM row copy
        return carry

    jax.lax.fori_loop(0, tile, body, 0)


# ---------------------------------------------------------------------------
# Wrapper
# ---------------------------------------------------------------------------
def _vmem_capacity_bytes():
    try:
        info = pltpu.get_tpu_info()
        cap = int(getattr(info, "vmem_capacity_bytes", 0))
        if cap > 0:
            return cap
    except Exception:
        pass
    return 128 << 20   # v5e/v6e default


def word_embedding(x_index, emb_table, *, tokens_per_tile=1024):
    """Pallas equivalent of `embed(X_index.long()).squeeze(-2)`.

    x_index  : (..., 1) integer array
    emb_table: (V, D) float embedding weights (frozen)
    returns  : x_index.shape[:-1] + (D,), dtype of emb_table
    """
    assert x_index.shape[-1] == 1, "expected trailing singleton index dim (squeeze(-2))"
    V, D = emb_table.shape
    out_dtype = emb_table.dtype
    itemsize = jnp.dtype(out_dtype).itemsize

    flat_idx = x_index.reshape(-1).astype(jnp.int32)          # (N,)
    n_tokens = flat_idx.shape[0]

    # Lane-dense output layout: pad the feature dim to a multiple of 128.
    d_pad = _round_up(max(D, 128), 128)
    # Vocab chunking for the one-hot path: pad V to num_chunks equal chunks.
    num_chunks = max(1, -(-V // _VOCAB_CHUNK_TARGET))         # cdiv
    v_chunk = _round_up(-(-V // num_chunks), 8)
    v_pad = v_chunk * num_chunks

    table = emb_table
    if (v_pad, d_pad) != (V, D):
        table = jnp.pad(emb_table, ((0, v_pad - V), (0, d_pad - D)))

    # Generation-aware VMEM budget (v7x: 64 MiB/TC, v5e/v6e: 128 MiB).
    vmem_cap = _vmem_capacity_bytes()
    vmem_budget = int(vmem_cap * 0.80)                        # headroom for Mosaic
    # Budget the resident table at 2x in case the invariant block is
    # double-buffered by the pipeline.
    table_budget = 2 * v_pad * d_pad * itemsize

    if table_budget + (8 << 20) > vmem_budget:
        # Table too large to keep VMEM-resident on this generation.
        # TODO(synk): pl.ANY HBM table + scalar-prefetch-driven, double-buffered
        # per-row DMA gather kernel; plain XLA gather fallback for now.
        out = jnp.take(emb_table, flat_idx, axis=0)
        return out.reshape(x_index.shape[:-1] + (D,)).astype(out_dtype)

    # Token-tile size: as big as the remaining VMEM budget allows.
    per_token_bytes = (2 * d_pad * itemsize        # double-buffered output tile
                       + 2 * 4                     # indices (dbl-buffered / SMEM)
                       + d_pad * 4)                # fp32 accumulator value
    avail = max(vmem_budget - table_budget - (2 << 20), 8 * per_token_bytes)
    max_tile = max(8, (avail // per_token_bytes) // 8 * 8)
    tile = min(_round_up(max(tokens_per_tile, 8), 8),
               int(max_tile),
               _round_up(n_tokens, 8))
    tile = max(tile, 8)

    pad = (-n_tokens) % tile
    n_padded = n_tokens + pad
    grid = (n_padded // tile,)

    vmem_needed = table_budget + tile * per_token_bytes + (2 << 20)
    vmem_limit = int(min(max(vmem_needed, 16 << 20), vmem_budget))

    use_onehot = v_pad <= _ONEHOT_MAX_VOCAB

    if use_onehot:
        idx2d = flat_idx.reshape(-1, 1)
        if pad:
            idx2d = jnp.pad(idx2d, ((0, pad), (0, 0)))        # pad with row 0 (in range)
        kernel = functools.partial(_embed_onehot_kernel,
                                   v_chunk=v_chunk, num_chunks=num_chunks)
        out = pl.pallas_call(
            kernel,
            out_shape=jax.ShapeDtypeStruct((n_padded, d_pad), out_dtype),
            grid_spec=pltpu.PrefetchScalarGridSpec(
                num_scalar_prefetch=0,
                grid=grid,
                in_specs=[
                    # Token-index tile for this grid step.
                    pl.BlockSpec((tile, 1), lambda i: (i, 0)),
                    # Full embedding table, VMEM-resident (invariant index_map).
                    pl.BlockSpec((v_pad, d_pad), lambda i: (0, 0)),
                ],
                out_specs=pl.BlockSpec((tile, d_pad), lambda i: (i, 0)),
            ),
            compiler_params=pltpu.CompilerParams(
                dimension_semantics=("parallel",),
                vmem_limit_bytes=vmem_limit,
            ),
        )(idx2d, table)
    else:
        idx1d = flat_idx
        if pad:
            idx1d = jnp.pad(idx1d, (0, pad))
        kernel = functools.partial(_embed_row_gather_kernel, tile=tile)
        out = pl.pallas_call(
            kernel,
            out_shape=jax.ShapeDtypeStruct((n_padded, d_pad), out_dtype),
            grid_spec=pltpu.PrefetchScalarGridSpec(
                num_scalar_prefetch=1,                         # indices -> SMEM
                grid=grid,
                in_specs=[
                    pl.BlockSpec((v_pad, d_pad), lambda i, idx: (0, 0)),
                ],
                out_specs=pl.BlockSpec((tile, d_pad), lambda i, idx: (i, 0)),
            ),
            compiler_params=pltpu.CompilerParams(
                dimension_semantics=("parallel",),
                vmem_limit_bytes=vmem_limit,
            ),
        )(idx1d, table)

    if pad or d_pad != D:
        out = out[:n_tokens, :D]
    # embed(X).squeeze(-2): result shape == X.shape[:-1] + (D,)
    return out.reshape(x_index.shape[:-1] + (D,))


if __name__ == "__main__":
    key = jax.random.PRNGKey(0)
    k_emb, k_idx = jax.random.split(key)

    # Deterministic synthetic "vocab" embedding table (the real module copies a
    # frozen pickled table into nn.Embedding; here we synthesize it in-script).
    VOCAB = 64
    EMB_DIM = 128
    emb_table = jax.random.normal(k_emb, (VOCAB, EMB_DIM), dtype=jnp.float32)

    # X_index: (batch=2, seq=8, 1) integer indices, as the forward implies.
    B, S = 2, 8
    x_index = jax.random.randint(k_idx, (B, S, 1), minval=0, maxval=VOCAB,
                                 dtype=jnp.int32)

    out = word_embedding(x_index, emb_table)
    out = jax.block_until_ready(out)

    # Pure-JAX reference: embedding lookup + squeeze(-2).
    ref = jnp.take(emb_table, x_index.reshape(B, S), axis=0)
    assert out.shape == (B, S, EMB_DIM), out.shape
    assert jnp.allclose(out, ref), "mismatch vs reference embedding lookup"

    print("KERNEL_OK")
</pallas_src>

<mosaic_0001>
module attributes {stable_mosaic.version = 11 : i64} {
  func.func @_embed_onehot_kernel(%arg0: i32, %arg1: memref<16x1xi32, #tpu.memory_space<vmem>>, %arg2: memref<64x128xf32, #tpu.memory_space<vmem>>, %arg3: memref<16x128xf32, #tpu.memory_space<vmem>>) attributes {dimension_semantics = [#tpu.dimension_semantics<parallel>], iteration_bounds = array<i64: 1>, scalar_prefetch = 0 : i64, scratch_operands = 0 : i64, tpu.core_type = #tpu.core_type<tc>, window_params = [{transform_indices = @transform_0, window_bounds = array<i64: 16, 1>}, {pipeline_mode = #tpu.pipeline_mode<synchronous>, transform_indices = @transform_1, window_bounds = array<i64: 64, 128>}, {transform_indices = @transform_2, window_bounds = array<i64: 16, 128>}]} {
    %c0 = arith.constant 0 : index
    %c0_0 = arith.constant 0 : index
    %0 = vector.load %arg1[%c0, %c0_0] : memref<16x1xi32, #tpu.memory_space<vmem>>, vector<16x1xi32>
    %c0_1 = arith.constant 0 : index
    %c0_2 = arith.constant 0 : index
    %1 = vector.load %arg2[%c0_1, %c0_2] : memref<64x128xf32, #tpu.memory_space<vmem>>, vector<64x128xf32>
    %2 = tpu.iota {dimensions = array<i32: 1>} : vector<16x64xi32>
    %c0_i32 = arith.constant 0 : i32
    %3 = vector.broadcast %c0_i32 : i32 to vector<16x64xi32>
    %4 = arith.addi %2, %3 : vector<16x64xi32>
    %5 = vector.broadcast %0 : vector<16x1xi32> to vector<16x64xi32>
    %6 = arith.cmpi eq, %4, %5 : vector<16x64xi32>
    %7 = arith.extui %6 : vector<16x64xi1> to vector<16x64xi32>
    %8 = arith.sitofp %7 : vector<16x64xi32> to vector<16x64xf32>
    %cst = arith.constant dense<0.000000e+00> : vector<16x128xf32>
    %9 = tpu.matmul %8, %1, %cst {dimension_numbers = #tpu.dot_dimension_numbers<[1], [0], [0], [1], [0, 0, 1, 1], [], []>} : vector<16x64xf32>, vector<64x128xf32>, vector<16x128xf32> -> vector<16x128xf32>
    %c0_3 = arith.constant 0 : index
    %c0_4 = arith.constant 0 : index
    %10 = vector.load %arg3[%c0_3, %c0_4] : memref<16x128xf32, #tpu.memory_space<vmem>>, vector<16x128xf32>
    tpu.vector_store %arg3[%c0_3, %c0_4], %9 {strides = array<i32>} : memref<16x128xf32, #tpu.memory_space<vmem>>, vector<16x128xf32>,
    return
  }
  func.func @transform_0(%arg0: i32) -> (i32, i32) {
    %c0_i32 = arith.constant 0 : i32
    %c0_i32_0 = arith.constant 0 : i32
    return %arg0, %c0_i32 : i32, i32
  }
  func.func @transform_1(%arg0: i32) -> (i32, i32) {
    %c0_i32 = arith.constant 0 : i32
    %c0_i32_0 = arith.constant 0 : i32
    %c0_i32_1 = arith.constant 0 : i32
    return %c0_i32, %c0_i32_0 : i32, i32
  }
  func.func @transform_2(%arg0: i32) -> (i32, i32) {
    %c0_i32 = arith.constant 0 : i32
    %c0_i32_0 = arith.constant 0 : i32
    return %arg0, %c0_i32 : i32, i32
  }
}

</mosaic_0001>

<bundles_post_ra>
// kernel: tpu_custom_call.1
= control target key start
LH: loop header
LB: loop body
LE: loop exit
PB: predicated region body
PF: predicated region fallthrough
CT: control target
= control target key end

     0   :  { %7 = vsyncpa [#allocation3], 0  ;;  %s312_s0 = inlined_call_operand.vmem [shape: s32[16,1], index: 0, kind: input, shape index: {}]   ;;  %s313_s1 = inlined_call_operand.hbm [shape: f32[64,128], index: 1, kind: input, shape index: {}]   ;;  %s314_s2 = inlined_call_operand.hbm [shape: f32[16,128], index: 2, kind: output, shape index: {}]  }
   0x1   :  { %8 = vsyncpa [#allocation4], 0  ;;  %s255_s9 = smov [#allocation2]   ;;  %s207_s13 = scalar_lea.hbm %s313_s1, 1024 }
   0x2   :  { %s16_s10 = sshll.u32 %s255_s9, 4  ;;  %p208_p0 = scmp.ne.s32.totalorder %s313_s1, %s207_s13  ;;  %s17_s10 = int_to_ptr.vmem [resolvable:$true] %s16_s10 }
   0x3   :  { %p211_p1 = scmp.lt.u32.totalorder %s207_s13, %s313_s1 }
   0x5   :  { %p213_p2 = pnand %p211_p1, %p208_p0 }
   0x7   :  { %216 = shalt.err (!%p213_p2)
}
   0x8   :  { %s217_s18 = scalar_lea.vmem %s17_s10, 1024  ;;  %p222_p4 = scmp.lt.s32.totalorder %s17_s10, %s17_s10 }
   0x9   :  { %p218_p3 = scmp.ne.s32.totalorder %s17_s10, %s217_s18  ;;  %p223_p5 = scmp.lt.s32.totalorder %s217_s18, %s217_s18 }
   0xb   :  { %p224_p6 = por %p223_p5, %p222_p4 }
   0xd   :  { %p225_p7 = pnand %p224_p6, %p218_p3 }
   0xf   :  { %228 = shalt.err (!%p225_p7)
}
  0x10   :  { %s256_s19 = smov 128   ;;  %s257_s20 = smov 8  }
  0x11   :  { %22 = dma.hbm_to_vmem [thread:$0]  %s313_s1, 1024, %s17_s10, [#allocation3], %s256_s19, %s256_s19, %s257_s20  }
  0x12   :  { %251 = dma.done.wait [#allocation3], 1024  }
  0x13   :  { %252 = vsyncadd [#allocation3], 4294966272  ;;  %v258_v0 = vmov 0   ;;  %v26_v1 = vld [vmem:[%s312_s0] sm:$0xff]  ;;  %v29_v3 = vld [vmem:[#allocation2 + $0x8] sm:$0xff]  ;;  %v36_v15 = vlaneseq  ;;  %vm50_vm0 = vcmask 523264  }
  0x14   :  { %206 = vset.pattern.permute.xlu0 %v258_v0  ;;  %v28_v2 = vld [vmem:[#allocation2] sm:$0xff]  ;;  %v30_v4 = vld [vmem:[#allocation2 + $0x10] sm:$0xff]  ;;  %v31_v5 = vld [vmem:[#allocation2 + $0x18] sm:$0xff]  ;;  %v259_v18 = vmov 0.0  }
  0x15   :  { %39 = vperm.xlu0 %206, %v26_v1   ;;  %v27_v6 = vld [vmem:[%s312_s0 + $0x8] sm:$0xff]  ;;  %v184_v7 = vpack.c.bf16 %v29_v3, %v28_v2  ;;  %v188_v8 = vpack.c.bf16 %v31_v5, %v30_v4  ;;  %v32_v9 = vld [vmem:[#allocation2 + $0x20] sm:$0xff]  ;;  %v34_v12 = vld [vmem:[#allocation2 + $0x30] sm:$0xff]  ;;  %v37_v16 = vand.u32 127, %v36_v15  ;;  %s260_s0 = smov [#allocation5]  }
  0x16   :  { %v33_v10 = vld [vmem:[#allocation2 + $0x28] sm:$0xff]  ;;  %v35_v13 = vld [vmem:[#allocation2 + $0x38] sm:$0xff]  ;;  %s139_s1 = sshll.u32 %s260_s0, 4  ;;  %s140_s1 = int_to_ptr.vmem [resolvable:$true] %s139_s1 }
  0x17   :  { %185 = vmatprep.subr.bf16.mxu0 %v184_v7  ;;  %v192_v11 = vpack.c.bf16 %v33_v10, %v32_v9  ;;  %v196_v14 = vpack.c.bf16 %v35_v13, %v34_v12  ;;  %s229_s27 = scalar_lea.vmem %s140_s1, 256  ;;  %p234_p9 = scmp.lt.s32.totalorder %s140_s1, %s140_s1 }
  0x18   :  { %187 = vmatpush3.bf16.msra.mxu0 %v184_v7  ;;  %p230_p8 = scmp.ne.s32.totalorder %s140_s1, %s229_s27  ;;  %p235_p10 = scmp.lt.s32.totalorder %s229_s27, %s229_s27 }
  0x19   :  { %42 = vperm.xlu0 %206, %v27_v6   ;;  %189 = vmatprep.subr.bf16.mxu0 %v188_v8 }
  0x1a   :  { %p236_p11 = por %p235_p10, %p234_p9 }
  0x1c   :  { %191 = vmatpush3.bf16.msra.mxu0 %v188_v8  ;;  %p237_p12 = pnand %p236_p11, %p230_p8 }
  0x1d   :  { %193 = vmatprep.subr.bf16.mxu0 %v192_v11 }
  0x20   :  { %195 = vmatpush3.bf16.msra.mxu0 %v192_v11 }
  0x21   :  { %197 = vmatprep.subr.bf16.mxu0 %v196_v14 }
  0x24   :  { %199 = vmatpush3.bf16.msra.mxu0 %v196_v14 }
  0x94   :  { %v40_v17 = vpop.permute.xlu0 %39 }
  0x95   :  { %vm44_vm1 = vcmp.eq.s32.totalorder %v37_v16, %v40_v17 }
  0x96   :  { %v151_v19 = vsel %vm44_vm1, 1.0, %v259_v18 }
  0x97   :  { %181 = vmatprep.mubr.msk.f32.mxu0 %vm50_vm0, %v151_v19 }
  0x98   :  { %v43_v20 = vpop.permute.xlu0 %42 }
  0x99   :  { %vm45_vm2 = vcmp.eq.s32.totalorder %v37_v16, %v43_v20 }
  0x9a   :  { %v152_v21 = vsel %vm45_vm2, 1.0, %v259_v18 }
  0x9b   :  { %182 = vmatmul.mubr.msk.f32.vlgmr.msra.gmra.mrb[0].mxu0 %vm50_vm0, %v152_v21 }
 0x16e   :  { %v183_v22 = vpop.f32.mrb[0].mxu0 }
 0x16f   :  { %133 = vst [vmem:[#allocation5 + $0x8] sm:$0xff] %v183_v22  ;;  %v123_v23 = vpop.f32.mrb[1].mxu0 }
 0x170   :  { %132 = vst [vmem:[#allocation5] sm:$0xff] %v123_v23 }
 0x171   :  { %240 = shalt.err (!%p237_p12)
}
 0x172   :  { %s241_s30 = scalar_lea.hbm %s314_s2, 256 }
 0x173   :  { %p242_p13 = scmp.ne.s32.totalorder %s314_s2, %s241_s30  ;;  %p245_p0 = scmp.lt.u32.totalorder %s241_s30, %s314_s2 }
 0x175   :  { %p247_p1 = pnand %p245_p0, %p242_p13 }
 0x177   :  { %250 = shalt.err (!%p247_p1)
}
 0x178   :  { %145 = dma.vmem_to_hbm [thread:$0]  %s140_s1, 256, %s314_s2, [#allocation4], %s256_s19, %s256_s19, %s257_s20  }
 0x179   :  { %253 = dma.done.wait [#allocation4], 256  }
 0x17a   :  { %254 = vsyncadd [#allocation4], 4294967040 }
 0x17b   :  { %149 = vsyncpa [#allocation3], 1 }
 0x17c   :  { %150 = vsyncpa [#allocation4], 1 }

</bundles_post_ra>
